<compile_context>
chip_gen: v7x
topology: tpu7x:2x2x1
jax: 0.10.0
libtpu: 0.0.40
codegen_flags: <defaults>
</compile_context>

<pallas_src>
import functools

import jax
import jax.numpy as jnp
from jax import lax
from jax.experimental import pallas as pl
from jax.experimental.pallas import tpu as pltpu


# --------------------------- pass 1: forward_sa + low-rank projections -------
def sa_kernel(qa_ref, qb_ref, w1_ref, w2_ref, wa_ref, ba_ref, wb_ref, bb_ref,
              b1_ref, b2_ref,
              qa_att_ref, qb_att_ref, qa_bf_ref, qb_bf_ref,
              qa_low_ref, qb_low_ref, *, hw_valid, hw_padded):
    f32 = jnp.float32
    bf16 = jnp.bfloat16

    qa = qa_ref[0]                       # (C, HWp)
    qb = qb_ref[0]
    w1 = w1_ref[...]                     # (1, C)
    w2 = w2_ref[...]
    wa = wa_ref[...]                     # (dp, C)  (zero-padded rows)
    wb = wb_ref[...]
    ba = ba_ref[...]                     # (dp, 1)
    bb = bb_ref[...]
    b1 = b1_ref[0, 0]                    # scalar conv biases live in SMEM
    b2 = b2_ref[0, 0]

    # 1x1 conv -> logits over flattened spatial axis.
    la = jnp.dot(w1, qa, preferred_element_type=f32) + b1      # (1, HWp)
    lb = jnp.dot(w2, qb, preferred_element_type=f32) + b2
    if hw_padded != hw_valid:            # static: mask padded lanes
        col = lax.broadcasted_iota(jnp.int32, (1, hw_padded), 1)
        neg = jnp.float32(-1e30)
        la = jnp.where(col < hw_valid, la, neg)
        lb = jnp.where(col < hw_valid, lb, neg)

    ea = jnp.exp(la - jnp.max(la, axis=-1, keepdims=True))
    eb = jnp.exp(lb - jnp.max(lb, axis=-1, keepdims=True))
    aa = ea / jnp.sum(ea, axis=-1, keepdims=True)
    ab = eb / jnp.sum(eb, axis=-1, keepdims=True)

    qa_att = aa * qa                     # (C, HWp) f32, padded cols exactly 0
    qb_att = ab * qb
    qa_att_ref[0] = qa_att
    qb_att_ref[0] = qb_att
    qa_bf_ref[0] = qa_att.astype(bf16)   # MXU operands for pass 2
    qb_bf_ref[0] = qb_att.astype(bf16)

    # Low-rank 1x1 conv; bf16 output -> bf16 operands for the affinity matmul.
    qa_low = jnp.dot(wa, qa_att, preferred_element_type=f32) + ba  # (dp, HWp)
    qb_low = jnp.dot(wb, qb_att, preferred_element_type=f32) + bb
    qa_low_ref[0] = qa_low.astype(bf16)
    qb_low_ref[0] = qb_low.astype(bf16)


# --------------------------- pass 2: affinity + Za / Zb ----------------------
def co_kernel(qa_bf_ref, qb_bf_ref, qa_low_ref, qb_low_ref,
              za_ref, zb_ref, *, ts, tanh_in_bf16):
    f32 = jnp.float32
    bf16 = jnp.bfloat16
    eps2 = jnp.float32(1e-24)

    off = pl.multiple_of(pl.program_id(1) * ts, 128)

    def _tanh(x):
        if tanh_in_bf16:                 # bf16 EUP path (v6e/v7x)
            return jnp.tanh(x.astype(bf16))
        return jnp.tanh(x).astype(bf16)  # f32 EUP path (v5e)

    # Za[:, blk] = Qb_att @ tanh(L[:, blk]),  L = Qb_low^T @ Qa_low.
    l_blk = lax.dot_general(qb_low_ref[0], qa_low_ref[0, :, pl.ds(off, ts)],
                            (((0,), (0,)), ((), ())),
                            preferred_element_type=f32)        # (HWp, ts)
    za = jnp.dot(qb_bf_ref[0], _tanh(l_blk), preferred_element_type=f32)  # (C, ts)
    # F.normalize over channels: x * rsqrt(max(sum x^2, eps^2)).
    za_inv = lax.rsqrt(jnp.maximum(jnp.sum(za * za, axis=0, keepdims=True), eps2))
    za_ref[0] = za * za_inv

    # Zb[:, blk] = Qa_att @ tanh(L^T[:, blk]); L^T recomputed on the MXU
    # (contraction length d) instead of transposing the big slab.
    lt_blk = lax.dot_general(qa_low_ref[0], qb_low_ref[0, :, pl.ds(off, ts)],
                             (((0,), (0,)), ((), ())),
                             preferred_element_type=f32)       # (HWp, ts)
    zb = jnp.dot(qa_bf_ref[0], _tanh(lt_blk), preferred_element_type=f32)
    zb_inv = lax.rsqrt(jnp.maximum(jnp.sum(zb * zb, axis=0, keepdims=True), eps2))
    zb_ref[0] = zb * zb_inv


# --------------------------- generation-aware knobs --------------------------
def _tpu_generation_config():
    """Return (vmem_budget_bytes, tanh_in_bf16) for the attached TPU."""
    kind = ""
    try:
        kind = jax.devices()[0].device_kind.lower()
    except Exception:
        pass
    budget = None
    try:
        budget = int(pltpu.get_tpu_info().vmem_capacity_bytes) * 3 // 4
    except Exception:
        budget = None
    if not budget:
        # v5e / v6e: 128 MiB physical VMEM; v7x: 64 MiB. Conservative otherwise.
        budget = 100 * 2**20 if ("v5" in kind or "v6" in kind) else 44 * 2**20
    tanh_in_bf16 = "v5" not in kind      # v5e has no bf16 EUP/VPU path
    return budget, tanh_in_bf16


def _pass1_vmem_bytes(C, HWp, dp):
    io = 2 * 2 * C * HWp * 4             # qa / qb f32 inputs (double-buffered)
    io += 2 * 2 * C * HWp * 4            # f32 attended outputs
    io += 2 * 2 * C * HWp * 2            # bf16 attended outputs
    io += 2 * 2 * dp * HWp * 2           # bf16 low-rank outputs
    tmp = 4 * C * HWp * 4                # attended values + softmax temporaries
    return io + tmp + (2 << 20)


def _pass2_vmem_bytes(C, HWp, ts, dp):
    io = 2 * 2 * C * HWp * 2             # attended bf16 inputs (double-buffered)
    io += 2 * 2 * dp * HWp * 2           # low-rank bf16 inputs
    io += 2 * 2 * C * ts * 4             # Za / Zb f32 output tiles
    tmp = HWp * ts * (4 + 2)             # ONE live affinity slab (f32 + bf16 tanh)
    tmp += 2 * C * ts * 4                # Za / Zb accumulators
    return io + tmp + (2 << 20)


# --------------------------- wrapper ------------------------------------------
def coattention(Qa, Qb, params, *, spatial_tile=1024):
    """Qa, Qb: (N, C, H, W) float32.  Returns (Za, Zb, Qa_attened, Qb_attened)."""
    N, C, H, W = Qa.shape
    HW = H * W
    d = params["wa"].shape[0]
    dp = ((d + 7) // 8) * 8              # pad low-rank dim with zero rows

    vmem_budget, tanh_in_bf16 = _tpu_generation_config()

    # Lane-dense flattened spatial axis (multiple of 128).
    HWp = ((HW + 127) // 128) * 128
    f32 = jnp.float32
    bf16 = jnp.bfloat16
    qa = Qa.astype(f32).reshape(N, C, HW)
    qb = Qb.astype(f32).reshape(N, C, HW)
    if HWp != HW:
        pad = HWp - HW
        qa = jnp.pad(qa, ((0, 0), (0, 0), (0, pad)))
        qb = jnp.pad(qb, ((0, 0), (0, 0), (0, pad)))

    # Zero-padded low-rank weights/biases (padded rows contribute exactly 0).
    wa = jnp.pad(params["wa"].astype(f32), ((0, dp - d), (0, 0)))
    wb = jnp.pad(params["wb"].astype(f32), ((0, dp - d), (0, 0)))
    ba = jnp.pad(params["ba"].astype(f32), ((0, dp - d), (0, 0)))
    bb = jnp.pad(params["bb"].astype(f32), ((0, dp - d), (0, 0)))

    # ---------------- pass 1: per-batch softmax / attended / projections -----
    full_f32 = pl.BlockSpec((1, C, HWp), lambda n: (n, 0, 0))
    low_spec = pl.BlockSpec((1, dp, HWp), lambda n: (n, 0, 0))
    smem_spec = pl.BlockSpec(memory_space=pltpu.MemorySpace.SMEM)

    est1 = _pass1_vmem_bytes(C, HWp, dp)
    qa_att, qb_att, qa_bf, qb_bf, qa_low, qb_low = pl.pallas_call(
        functools.partial(sa_kernel, hw_valid=HW, hw_padded=HWp),
        out_shape=(
            jax.ShapeDtypeStruct((N, C, HWp), f32),     # Qa_attened
            jax.ShapeDtypeStruct((N, C, HWp), f32),     # Qb_attened
            jax.ShapeDtypeStruct((N, C, HWp), bf16),    # bf16 copies for MXU
            jax.ShapeDtypeStruct((N, C, HWp), bf16),
            jax.ShapeDtypeStruct((N, dp, HWp), bf16),   # Qa_low
            jax.ShapeDtypeStruct((N, dp, HWp), bf16),   # Qb_low
        ),
        grid_spec=pltpu.PrefetchScalarGridSpec(
            num_scalar_prefetch=0,
            grid=(N,),
            in_specs=[
                full_f32, full_f32,
                pl.BlockSpec((1, C), lambda n: (0, 0)),     # w1
                pl.BlockSpec((1, C), lambda n: (0, 0)),     # w2
                pl.BlockSpec((dp, C), lambda n: (0, 0)),    # wa
                pl.BlockSpec((dp, 1), lambda n: (0, 0)),    # ba
                pl.BlockSpec((dp, C), lambda n: (0, 0)),    # wb
                pl.BlockSpec((dp, 1), lambda n: (0, 0)),    # bb
                smem_spec, smem_spec,                       # b1, b2 scalars
            ],
            out_specs=[full_f32, full_f32, full_f32, full_f32,
                       low_spec, low_spec],
        ),
        compiler_params=pltpu.CompilerParams(
            dimension_semantics=("parallel",),
            vmem_limit_bytes=int(min(max(est1 * 5 // 4, 32 * 2**20), vmem_budget)),
        ),
    )(qa, qb, params["w1"], params["w2"], wa, ba, wb, bb,
      params["b1"], params["b2"])

    # ---------------- pass 2: affinity slabs + Za / Zb ------------------------
    # Spatial tile: largest multiple of 128 dividing HWp that fits the budget.
    ts = max(128, (min(spatial_tile, HWp) // 128) * 128)
    while HWp % ts != 0:
        ts -= 128
    while ts > 128 and _pass2_vmem_bytes(C, HWp, ts, dp) > vmem_budget:
        ts -= 128
        while HWp % ts != 0:
            ts -= 128
    n_tiles = HWp // ts

    full_bf = pl.BlockSpec((1, C, HWp), lambda n, s: (n, 0, 0))
    low_bf = pl.BlockSpec((1, dp, HWp), lambda n, s: (n, 0, 0))
    out_blk = pl.BlockSpec((1, C, ts), lambda n, s: (n, 0, s))

    est2 = _pass2_vmem_bytes(C, HWp, ts, dp)
    za, zb = pl.pallas_call(
        functools.partial(co_kernel, ts=ts, tanh_in_bf16=tanh_in_bf16),
        out_shape=(jax.ShapeDtypeStruct((N, C, HWp), f32),
                   jax.ShapeDtypeStruct((N, C, HWp), f32)),
        grid_spec=pltpu.PrefetchScalarGridSpec(
            num_scalar_prefetch=0,
            grid=(N, n_tiles),
            in_specs=[full_bf, full_bf, low_bf, low_bf],
            out_specs=[out_blk, out_blk],
        ),
        compiler_params=pltpu.CompilerParams(
            dimension_semantics=("parallel", "parallel"),
            vmem_limit_bytes=int(min(max(est2 * 5 // 4, 32 * 2**20), vmem_budget)),
        ),
    )(qa_bf, qb_bf, qa_low, qb_low)

    def _unpad(x):
        return x[:, :, :HW].reshape(N, C, H, W)

    return _unpad(za), _unpad(zb), _unpad(qa_att), _unpad(qb_att)


# --------------------------- pure-JAX reference --------------------------------
def coattention_ref(Qa, Qb, params):
    """Pure-JAX f32 reference mirroring the PyTorch forward."""
    N, C, H, W = Qa.shape
    HW = H * W
    qa = Qa.reshape(N, C, HW)
    qb = Qb.reshape(N, C, HW)
    la = jnp.einsum("oc,ncs->nos", params["w1"], qa) + params["b1"][0, 0]
    lb = jnp.einsum("oc,ncs->nos", params["w2"], qb) + params["b2"][0, 0]
    aa = jax.nn.softmax(la, axis=-1)
    ab = jax.nn.softmax(lb, axis=-1)
    qa1 = aa * qa
    qb1 = ab * qb
    qa_low = jnp.einsum("dc,ncs->nds", params["wa"], qa1) + params["ba"][None]
    qb_low = jnp.einsum("dc,ncs->nds", params["wb"], qb1) + params["bb"][None]
    L = jnp.einsum("ndi,ndj->nij", qb_low, qa_low)
    A = jnp.tanh(L)
    za = jnp.einsum("ncj,nji->nci", qb1, A)
    zb = jnp.einsum("ncj,nij->nci", qa1, A)
    za = za / jnp.maximum(jnp.sqrt(jnp.sum(za * za, axis=1, keepdims=True)), 1e-12)
    zb = zb / jnp.maximum(jnp.sqrt(jnp.sum(zb * zb, axis=1, keepdims=True)), 1e-12)
    return (za.reshape(N, C, H, W), zb.reshape(N, C, H, W),
            qa1.reshape(N, C, H, W), qb1.reshape(N, C, H, W))


if __name__ == "__main__":
    def _run_case(N, C, H, W, spatial_tile, tols):
        d = max(C // 16, 1)
        key = jax.random.PRNGKey(0)
        ks = jax.random.split(key, 10)
        Qa = jax.random.normal(ks[0], (N, C, H, W), dtype=jnp.float32)
        Qb = jax.random.normal(ks[1], (N, C, H, W), dtype=jnp.float32)
        scale = 0.1
        params = {
            "w1": scale * jax.random.normal(ks[2], (1, C), dtype=jnp.float32),
            "b1": scale * jax.random.normal(ks[3], (1, 1), dtype=jnp.float32),
            "w2": scale * jax.random.normal(ks[4], (1, C), dtype=jnp.float32),
            "b2": scale * jax.random.normal(ks[5], (1, 1), dtype=jnp.float32),
            "wa": scale * jax.random.normal(ks[6], (d, C), dtype=jnp.float32),
            "ba": scale * jax.random.normal(ks[7], (d, 1), dtype=jnp.float32),
            "wb": scale * jax.random.normal(ks[8], (d, C), dtype=jnp.float32),
            "bb": scale * jax.random.normal(ks[9], (d, 1), dtype=jnp.float32),
        }
        outs = jax.block_until_ready(
            coattention(Qa, Qb, params, spatial_tile=spatial_tile))
        refs = coattention_ref(Qa, Qb, params)
        names = ["Za", "Zb", "Qa_att", "Qb_att"]
        for name, o, r, tol in zip(names, outs, refs, tols):
            assert jnp.allclose(o, r, atol=tol, rtol=tol), \
                f"{name} mismatch vs reference (N={N},C={C},H={H},W={W})"

    # Za/Zb use bf16 MXU operands / bf16 tanh (f32 accumulation) -> looser
    # tolerance; attended features stay on the pure-f32 path.
    tols = [3e-2, 3e-2, 1e-4, 1e-4]
    # Case 1: HW=200 -> padded to 256 and split into two 128-wide spatial
    # tiles (exercises padded-lane masking and the multi-tile path).
    _run_case(2, 32, 10, 20, 128, tols)
    # Case 2: lane-exact HW=128, single tile, default tile size.
    _run_case(1, 32, 8, 16, 1024, tols)
    print("KERNEL_OK")
</pallas_src>

<mosaic_0001>
module attributes {stable_mosaic.version = 11 : i64} {
  func.func @sa_kernel(%arg0: i32, %arg1: memref<1x32x256xf32, #tpu.memory_space<vmem>>, %arg2: memref<1x32x256xf32, #tpu.memory_space<vmem>>, %arg3: memref<1x32xf32, #tpu.memory_space<vmem>>, %arg4: memref<1x32xf32, #tpu.memory_space<vmem>>, %arg5: memref<8x32xf32, #tpu.memory_space<vmem>>, %arg6: memref<8x1xf32, #tpu.memory_space<vmem>>, %arg7: memref<8x32xf32, #tpu.memory_space<vmem>>, %arg8: memref<8x1xf32, #tpu.memory_space<vmem>>, %arg9: memref<1x1xf32, #tpu.memory_space<smem>>, %arg10: memref<1x1xf32, #tpu.memory_space<smem>>, %arg11: memref<1x32x256xf32, #tpu.memory_space<vmem>>, %arg12: memref<1x32x256xf32, #tpu.memory_space<vmem>>, %arg13: memref<1x32x256xbf16, #tpu.memory_space<vmem>>, %arg14: memref<1x32x256xbf16, #tpu.memory_space<vmem>>, %arg15: memref<1x8x256xbf16, #tpu.memory_space<vmem>>, %arg16: memref<1x8x256xbf16, #tpu.memory_space<vmem>>) attributes {dimension_semantics = [#tpu.dimension_semantics<parallel>], iteration_bounds = array<i64: 2>, scalar_prefetch = 0 : i64, scratch_operands = 0 : i64, tpu.core_type = #tpu.core_type<tc>, window_params = [{transform_indices = @transform_0, window_bounds = array<i64: 1, 32, 256>}, {transform_indices = @transform_1, window_bounds = array<i64: 1, 32, 256>}, {pipeline_mode = #tpu.pipeline_mode<synchronous>, transform_indices = @transform_2, window_bounds = array<i64: 1, 32>}, {pipeline_mode = #tpu.pipeline_mode<synchronous>, transform_indices = @transform_3, window_bounds = array<i64: 1, 32>}, {pipeline_mode = #tpu.pipeline_mode<synchronous>, transform_indices = @transform_4, window_bounds = array<i64: 8, 32>}, {pipeline_mode = #tpu.pipeline_mode<synchronous>, transform_indices = @transform_5, window_bounds = array<i64: 8, 1>}, {pipeline_mode = #tpu.pipeline_mode<synchronous>, transform_indices = @transform_6, window_bounds = array<i64: 8, 32>}, {pipeline_mode = #tpu.pipeline_mode<synchronous>, transform_indices = @transform_7, window_bounds = array<i64: 8, 1>}, {transform_indices = @transform_8, window_bounds = array<i64: 1, 1>}, {transform_indices = @transform_9, window_bounds = array<i64: 1, 1>}, {transform_indices = @transform_10, window_bounds = array<i64: 1, 32, 256>}, {transform_indices = @transform_11, window_bounds = array<i64: 1, 32, 256>}, {transform_indices = @transform_12, window_bounds = array<i64: 1, 32, 256>}, {transform_indices = @transform_13, window_bounds = array<i64: 1, 32, 256>}, {transform_indices = @transform_14, window_bounds = array<i64: 1, 8, 256>}, {transform_indices = @transform_15, window_bounds = array<i64: 1, 8, 256>}]} {
    %c0 = arith.constant 0 : index
    %c0_0 = arith.constant 0 : index
    %c0_1 = arith.constant 0 : index
    %0 = vector.load %arg1[%c0, %c0_0, %c0_1] : memref<1x32x256xf32, #tpu.memory_space<vmem>>, vector<1x32x256xf32>
    %1 = vector.shape_cast %0 : vector<1x32x256xf32> to vector<32x256xf32>
    %c0_2 = arith.constant 0 : index
    %c0_3 = arith.constant 0 : index
    %c0_4 = arith.constant 0 : index
    %2 = vector.load %arg2[%c0_2, %c0_3, %c0_4] : memref<1x32x256xf32, #tpu.memory_space<vmem>>, vector<1x32x256xf32>
    %3 = vector.shape_cast %2 : vector<1x32x256xf32> to vector<32x256xf32>
    %c0_5 = arith.constant 0 : index
    %c0_6 = arith.constant 0 : index
    %4 = vector.load %arg3[%c0_5, %c0_6] : memref<1x32xf32, #tpu.memory_space<vmem>>, vector<1x32xf32>
    %c0_7 = arith.constant 0 : index
    %c0_8 = arith.constant 0 : index
    %5 = vector.load %arg4[%c0_7, %c0_8] : memref<1x32xf32, #tpu.memory_space<vmem>>, vector<1x32xf32>
    %c0_9 = arith.constant 0 : index
    %c0_10 = arith.constant 0 : index
    %6 = vector.load %arg5[%c0_9, %c0_10] : memref<8x32xf32, #tpu.memory_space<vmem>>, vector<8x32xf32>
    %c0_11 = arith.constant 0 : index
    %c0_12 = arith.constant 0 : index
    %7 = vector.load %arg7[%c0_11, %c0_12] : memref<8x32xf32, #tpu.memory_space<vmem>>, vector<8x32xf32>
    %c0_13 = arith.constant 0 : index
    %c0_14 = arith.constant 0 : index
    %8 = vector.load %arg6[%c0_13, %c0_14] : memref<8x1xf32, #tpu.memory_space<vmem>>, vector<8x1xf32>
    %c0_15 = arith.constant 0 : index
    %c0_16 = arith.constant 0 : index
    %9 = vector.load %arg8[%c0_15, %c0_16] : memref<8x1xf32, #tpu.memory_space<vmem>>, vector<8x1xf32>
    %c0_17 = arith.constant 0 : index
    %c0_18 = arith.constant 0 : index
    %10 = memref.load %arg9[%c0_17, %c0_18] : memref<1x1xf32, #tpu.memory_space<smem>>
    %c0_19 = arith.constant 0 : index
    %c0_20 = arith.constant 0 : index
    %11 = memref.load %arg10[%c0_19, %c0_20] : memref<1x1xf32, #tpu.memory_space<smem>>
    %cst = arith.constant dense<0.000000e+00> : vector<1x256xf32>
    %12 = tpu.matmul %4, %1, %cst {dimension_numbers = #tpu.dot_dimension_numbers<[1], [0], [0], [1], [0, 0, 1, 1], [], []>} : vector<1x32xf32>, vector<32x256xf32>, vector<1x256xf32> -> vector<1x256xf32>
    %13 = vector.broadcast %10 : f32 to vector<1x256xf32>
    %14 = arith.addf %12, %13 : vector<1x256xf32>
    %cst_21 = arith.constant dense<0.000000e+00> : vector<1x256xf32>
    %15 = tpu.matmul %5, %3, %cst_21 {dimension_numbers = #tpu.dot_dimension_numbers<[1], [0], [0], [1], [0, 0, 1, 1], [], []>} : vector<1x32xf32>, vector<32x256xf32>, vector<1x256xf32> -> vector<1x256xf32>
    %16 = vector.broadcast %11 : f32 to vector<1x256xf32>
    %17 = arith.addf %15, %16 : vector<1x256xf32>
    %18 = tpu.iota {dimensions = array<i32: 1>} : vector<1x256xi32>
    %c200_i32 = arith.constant 200 : i32
    %19 = vector.broadcast %c200_i32 : i32 to vector<1x256xi32>
    %20 = arith.cmpi slt, %18, %19 : vector<1x256xi32>
    %cst_22 = arith.constant -1.000000e+30 : f32
    %21 = vector.broadcast %cst_22 : f32 to vector<1x256xf32>
    %22 = arith.select %20, %14, %21 : vector<1x256xi1>, vector<1x256xf32>
    %c200_i32_23 = arith.constant 200 : i32
    %23 = vector.broadcast %c200_i32_23 : i32 to vector<1x256xi32>
    %24 = arith.cmpi slt, %18, %23 : vector<1x256xi32>
    %cst_24 = arith.constant -1.000000e+30 : f32
    %25 = vector.broadcast %cst_24 : f32 to vector<1x256xf32>
    %26 = arith.select %24, %17, %25 : vector<1x256xi1>, vector<1x256xf32>
    %cst_25 = arith.constant dense<0xFF800000> : vector<1xf32>
    %27 = vector.multi_reduction <maximumf>, %22, %cst_25 [1] : vector<1x256xf32> to vector<1xf32>
    %28 = vector.shape_cast %27 : vector<1xf32> to vector<1x1xf32>
    %29 = vector.broadcast %28 : vector<1x1xf32> to vector<1x256xf32>
    %30 = arith.subf %22, %29 : vector<1x256xf32>
    %31 = math.exp %30 : vector<1x256xf32>
    %cst_26 = arith.constant dense<0xFF800000> : vector<1xf32>
    %32 = vector.multi_reduction <maximumf>, %26, %cst_26 [1] : vector<1x256xf32> to vector<1xf32>
    %33 = vector.shape_cast %32 : vector<1xf32> to vector<1x1xf32>
    %34 = vector.broadcast %33 : vector<1x1xf32> to vector<1x256xf32>
    %35 = arith.subf %26, %34 : vector<1x256xf32>
    %36 = math.exp %35 : vector<1x256xf32>
    %cst_27 = arith.constant dense<0.000000e+00> : vector<1xf32>
    %37 = vector.multi_reduction <add>, %31, %cst_27 [1] : vector<1x256xf32> to vector<1xf32>
    %38 = vector.shape_cast %37 : vector<1xf32> to vector<1x1xf32>
    %39 = vector.broadcast %38 : vector<1x1xf32> to vector<1x256xf32>
    %40 = arith.divf %31, %39 : vector<1x256xf32>
    %cst_28 = arith.constant dense<0.000000e+00> : vector<1xf32>
    %41 = vector.multi_reduction <add>, %36, %cst_28 [1] : vector<1x256xf32> to vector<1xf32>
    %42 = vector.shape_cast %41 : vector<1xf32> to vector<1x1xf32>
    %43 = vector.broadcast %42 : vector<1x1xf32> to vector<1x256xf32>
    %44 = arith.divf %36, %43 : vector<1x256xf32>
    %45 = vector.broadcast %40 : vector<1x256xf32> to vector<32x256xf32>
    %46 = arith.mulf %45, %1 : vector<32x256xf32>
    %47 = vector.broadcast %44 : vector<1x256xf32> to vector<32x256xf32>
    %48 = arith.mulf %47, %3 : vector<32x256xf32>
    %c0_29 = arith.constant 0 : index
    %c0_30 = arith.constant 0 : index
    %c0_31 = arith.constant 0 : index
    %49 = vector.load %arg11[%c0_29, %c0_30, %c0_31] : memref<1x32x256xf32, #tpu.memory_space<vmem>>, vector<1x32x256xf32>
    %50 = vector.shape_cast %49 : vector<1x32x256xf32> to vector<32x256xf32>
    %51 = vector.shape_cast %46 : vector<32x256xf32> to vector<1x32x256xf32>
    tpu.vector_store %arg11[%c0_29, %c0_30, %c0_31], %51 {strides = array<i32>} : memref<1x32x256xf32, #tpu.memory_space<vmem>>, vector<1x32x256xf32>,
    %c0_32 = arith.constant 0 : index
    %c0_33 = arith.constant 0 : index
    %c0_34 = arith.constant 0 : index
    %52 = vector.load %arg12[%c0_32, %c0_33, %c0_34] : memref<1x32x256xf32, #tpu.memory_space<vmem>>, vector<1x32x256xf32>
    %53 = vector.shape_cast %52 : vector<1x32x256xf32> to vector<32x256xf32>
    %54 = vector.shape_cast %48 : vector<32x256xf32> to vector<1x32x256xf32>
    tpu.vector_store %arg12[%c0_32, %c0_33, %c0_34], %54 {strides = array<i32>} : memref<1x32x256xf32, #tpu.memory_space<vmem>>, vector<1x32x256xf32>,
    %55 = arith.truncf %46 : vector<32x256xf32> to vector<32x256xbf16>
    %c0_35 = arith.constant 0 : index
    %c0_36 = arith.constant 0 : index
    %c0_37 = arith.constant 0 : index
    %56 = vector.load %arg13[%c0_35, %c0_36, %c0_37] : memref<1x32x256xbf16, #tpu.memory_space<vmem>>, vector<1x32x256xbf16>
    %57 = vector.shape_cast %56 : vector<1x32x256xbf16> to vector<32x256xbf16>
    %58 = vector.shape_cast %55 : vector<32x256xbf16> to vector<1x32x256xbf16>
    tpu.vector_store %arg13[%c0_35, %c0_36, %c0_37], %58 {strides = array<i32>} : memref<1x32x256xbf16, #tpu.memory_space<vmem>>, vector<1x32x256xbf16>,
    %59 = arith.truncf %48 : vector<32x256xf32> to vector<32x256xbf16>
    %c0_38 = arith.constant 0 : index
    %c0_39 = arith.constant 0 : index
    %c0_40 = arith.constant 0 : index
    %60 = vector.load %arg14[%c0_38, %c0_39, %c0_40] : memref<1x32x256xbf16, #tpu.memory_space<vmem>>, vector<1x32x256xbf16>
    %61 = vector.shape_cast %60 : vector<1x32x256xbf16> to vector<32x256xbf16>
    %62 = vector.shape_cast %59 : vector<32x256xbf16> to vector<1x32x256xbf16>
    tpu.vector_store %arg14[%c0_38, %c0_39, %c0_40], %62 {strides = array<i32>} : memref<1x32x256xbf16, #tpu.memory_space<vmem>>, vector<1x32x256xbf16>,
    %cst_41 = arith.constant dense<0.000000e+00> : vector<8x256xf32>
    %63 = tpu.matmul %6, %46, %cst_41 {dimension_numbers = #tpu.dot_dimension_numbers<[1], [0], [0], [1], [0, 0, 1, 1], [], []>} : vector<8x32xf32>, vector<32x256xf32>, vector<8x256xf32> -> vector<8x256xf32>
    %64 = vector.broadcast %8 : vector<8x1xf32> to vector<8x256xf32>
    %65 = arith.addf %63, %64 : vector<8x256xf32>
    %cst_42 = arith.constant dense<0.000000e+00> : vector<8x256xf32>
    %66 = tpu.matmul %7, %48, %cst_42 {dimension_numbers = #tpu.dot_dimension_numbers<[1], [0], [0], [1], [0, 0, 1, 1], [], []>} : vector<8x32xf32>, vector<32x256xf32>, vector<8x256xf32> -> vector<8x256xf32>
    %67 = vector.broadcast %9 : vector<8x1xf32> to vector<8x256xf32>
    %68 = arith.addf %66, %67 : vector<8x256xf32>
    %69 = arith.truncf %65 : vector<8x256xf32> to vector<8x256xbf16>
    %c0_43 = arith.constant 0 : index
    %c0_44 = arith.constant 0 : index
    %c0_45 = arith.constant 0 : index
    %70 = vector.load %arg15[%c0_43, %c0_44, %c0_45] : memref<1x8x256xbf16, #tpu.memory_space<vmem>>, vector<1x8x256xbf16>
    %71 = vector.shape_cast %70 : vector<1x8x256xbf16> to vector<8x256xbf16>
    %72 = vector.shape_cast %69 : vector<8x256xbf16> to vector<1x8x256xbf16>
    tpu.vector_store %arg15[%c0_43, %c0_44, %c0_45], %72 {strides = array<i32>} : memref<1x8x256xbf16, #tpu.memory_space<vmem>>, vector<1x8x256xbf16>,
    %73 = arith.truncf %68 : vector<8x256xf32> to vector<8x256xbf16>
    %c0_46 = arith.constant 0 : index
    %c0_47 = arith.constant 0 : index
    %c0_48 = arith.constant 0 : index
    %74 = vector.load %arg16[%c0_46, %c0_47, %c0_48] : memref<1x8x256xbf16, #tpu.memory_space<vmem>>, vector<1x8x256xbf16>
    %75 = vector.shape_cast %74 : vector<1x8x256xbf16> to vector<8x256xbf16>
    %76 = vector.shape_cast %73 : vector<8x256xbf16> to vector<1x8x256xbf16>
    tpu.vector_store %arg16[%c0_46, %c0_47, %c0_48], %76 {strides = array<i32>} : memref<1x8x256xbf16, #tpu.memory_space<vmem>>, vector<1x8x256xbf16>,
    return
  }
  func.func @transform_0(%arg0: i32) -> (i32, i32, i32) {
    %c0_i32 = arith.constant 0 : i32
    %c0_i32_0 = arith.constant 0 : i32
    %c0_i32_1 = arith.constant 0 : i32
    return %arg0, %c0_i32, %c0_i32_0 : i32, i32, i32
  }
  func.func @transform_1(%arg0: i32) -> (i32, i32, i32) {
    %c0_i32 = arith.constant 0 : i32
    %c0_i32_0 = arith.constant 0 : i32
    %c0_i32_1 = arith.constant 0 : i32
    return %arg0, %c0_i32, %c0_i32_0 : i32, i32, i32
  }
  func.func @transform_2(%arg0: i32) -> (i32, i32) {
    %c0_i32 = arith.constant 0 : i32
    %c0_i32_0 = arith.constant 0 : i32
    %c0_i32_1 = arith.constant 0 : i32
    return %c0_i32, %c0_i32_0 : i32, i32
  }
  func.func @transform_3(%arg0: i32) -> (i32, i32) {
    %c0_i32 = arith.constant 0 : i32
    %c0_i32_0 = arith.constant 0 : i32
    %c0_i32_1 = arith.constant 0 : i32
    return %c0_i32, %c0_i32_0 : i32, i32
  }
  func.func @transform_4(%arg0: i32) -> (i32, i32) {
    %c0_i32 = arith.constant 0 : i32
    %c0_i32_0 = arith.constant 0 : i32
    %c0_i32_1 = arith.constant 0 : i32
    return %c0_i32, %c0_i32_0 : i32, i32
  }
  func.func @transform_5(%arg0: i32) -> (i32, i32) {
    %c0_i32 = arith.constant 0 : i32
    %c0_i32_0 = arith.constant 0 : i32
    %c0_i32_1 = arith.constant 0 : i32
    return %c0_i32, %c0_i32_0 : i32, i32
  }
  func.func @transform_6(%arg0: i32) -> (i32, i32) {
    %c0_i32 = arith.constant 0 : i32
    %c0_i32_0 = arith.constant 0 : i32
    %c0_i32_1 = arith.constant 0 : i32
    return %c0_i32, %c0_i32_0 : i32, i32
  }
  func.func @transform_7(%arg0: i32) -> (i32, i32) {
    %c0_i32 = arith.constant 0 : i32
    %c0_i32_0 = arith.constant 0 : i32
    %c0_i32_1 = arith.constant 0 : i32
    return %c0_i32, %c0_i32_0 : i32, i32
  }
  func.func @transform_8(%arg0: i32) -> (i32, i32) {
    %c0_i32 = arith.constant 0 : i32
    %c0_i32_0 = arith.constant 0 : i32
    %c0_i32_1 = arith.constant 0 : i32
    return %c0_i32, %c0_i32_0 : i32, i32
  }
  func.func @transform_9(%arg0: i32) -> (i32, i32) {
    %c0_i32 = arith.constant 0 : i32
    %c0_i32_0 = arith.constant 0 : i32
    %c0_i32_1 = arith.constant 0 : i32
    return %c0_i32, %c0_i32_0 : i32, i32
  }
  func.func @transform_10(%arg0: i32) -> (i32, i32, i32) {
    %c0_i32 = arith.constant 0 : i32
    %c0_i32_0 = arith.constant 0 : i32
    %c0_i32_1 = arith.constant 0 : i32
    return %arg0, %c0_i32, %c0_i32_0 : i32, i32, i32
  }
  func.func @transform_11(%arg0: i32) -> (i32, i32, i32) {
    %c0_i32 = arith.constant 0 : i32
    %c0_i32_0 = arith.constant 0 : i32
    %c0_i32_1 = arith.constant 0 : i32
    return %arg0, %c0_i32, %c0_i32_0 : i32, i32, i32
  }
  func.func @transform_12(%arg0: i32) -> (i32, i32, i32) {
    %c0_i32 = arith.constant 0 : i32
    %c0_i32_0 = arith.constant 0 : i32
    %c0_i32_1 = arith.constant 0 : i32
    return %arg0, %c0_i32, %c0_i32_0 : i32, i32, i32
  }
  func.func @transform_13(%arg0: i32) -> (i32, i32, i32) {
    %c0_i32 = arith.constant 0 : i32
    %c0_i32_0 = arith.constant 0 : i32
    %c0_i32_1 = arith.constant 0 : i32
    return %arg0, %c0_i32, %c0_i32_0 : i32, i32, i32
  }
  func.func @transform_14(%arg0: i32) -> (i32, i32, i32) {
    %c0_i32 = arith.constant 0 : i32
    %c0_i32_0 = arith.constant 0 : i32
    %c0_i32_1 = arith.constant 0 : i32
    return %arg0, %c0_i32, %c0_i32_0 : i32, i32, i32
  }
  func.func @transform_15(%arg0: i32) -> (i32, i32, i32) {
    %c0_i32 = arith.constant 0 : i32
    %c0_i32_0 = arith.constant 0 : i32
    %c0_i32_1 = arith.constant 0 : i32
    return %arg0, %c0_i32, %c0_i32_0 : i32, i32, i32
  }
}

</mosaic_0001>

<bundles_post_ra>
// kernel: tpu_custom_call.1
= control target key start
LH: loop header
LB: loop body
LE: loop exit
PB: predicated region body
PF: predicated region fallthrough
CT: control target
= control target key end

     0   :  { %s2621_s0 = inlined_call_operand.hbm [shape: f32[2,32,256], index: 0, kind: input, shape index: {}]   ;;  %s2622_s1 = inlined_call_operand.hbm [shape: f32[2,32,256], index: 1, kind: input, shape index: {}]   ;;  %s2623_s2 = inlined_call_operand.vmem [shape: f32[1,32], index: 2, kind: input, shape index: {}]   ;;  %s2624_s3 = inlined_call_operand.vmem [shape: f32[1,32], index: 3, kind: input, shape index: {}]   ;;  %s2625_s4 = inlined_call_operand.vmem [shape: f32[8,32], index: 4, kind: input, shape index: {}]   ;;  %s2626_s5 = inlined_call_operand.vmem [shape: f32[8,1], index: 5, kind: input, shape index: {}]   ;;  %s2627_s6 = inlined_call_operand.vmem [shape: f32[8,32], index: 6, kind: input, shape index: {}]   ;;  %s2628_s7 = inlined_call_operand.vmem [shape: f32[8,1], index: 7, kind: input, shape index: {}]   ;;  %s2629_s8 = inlined_call_operand.<no memory space> [shape: f32[1,1], index: 8, kind: input, shape index: {}]   ;;  %s2630_s9 = inlined_call_operand.<no memory space> [shape: f32[1,1], index: 9, kind: input, shape index: {}]   ;;  %s2631_s10 = inlined_call_operand.hbm [shape: f32[2,32,256], index: 10, kind: output, shape index: {0}]   ;;  %s2632_s11 = inlined_call_operand.hbm [shape: f32[2,32,256], index: 11, kind: output, shape index: {1}]   ;;  %s2633_s12 = inlined_call_operand.hbm [shape: bf16[2,32,256], index: 12, kind: output, shape index: {2}]   ;;  %s2634_s13 = inlined_call_operand.hbm [shape: bf16[2,32,256], index: 13, kind: output, shape index: {3}]   ;;  %s2635_s14 = inlined_call_operand.hbm [shape: bf16[2,8,256], index: 14, kind: output, shape index: {4}]   ;;  %s2636_s15 = inlined_call_operand.hbm [shape: bf16[2,8,256], index: 15, kind: output, shape index: {5}]  }
   0x1   :  { %2652 = sst [smem:[#allocation29_spill]] %s2621_s0 }
   0x2   :  { %2653 = sst [smem:[#allocation30_spill]] %s2622_s1 }
   0x3   :  { %2654 = sst [smem:[#allocation31_spill]] %s2623_s2 }
   0x4   :  { %2655 = sst [smem:[#allocation32_spill]] %s2624_s3 }
   0x5   :  { %2656 = sst [smem:[#allocation33_spill]] %s2625_s4 }
   0x6   :  { %2657 = sst [smem:[#allocation34_spill]] %s2635_s14 }
   0x7   :  { %2658 = sst [smem:[#allocation35_spill]] %s2636_s15 }
   0x8   :  { %21 = sst [smem:[#allocation2]] %s2629_s8 }
   0x9   :  { %22 = sst [smem:[#allocation3]] %s2630_s9 }
   0xa   :  { %23 = vsyncpa [#allocation5], 0 }
   0xb   :  { %25 = vsyncpa [#allocation5 + $0x1], 0 }
   0xc   :  { %26 = vsyncpa [#allocation8], 0 }
   0xd   :  { %28 = vsyncpa [#allocation8 + $0x1], 0 }
   0xe   :  { %29 = vsyncpa [#allocation6], 0 }
   0xf   :  { %31 = vsyncpa [#allocation6 + $0x1], 0 }
  0x10   :  { %32 = vsyncpa [#allocation11], 0 }
  0x11   :  { %34 = vsyncpa [#allocation11 + $0x1], 0 }
  0x12   :  { %35 = vsyncpa [#allocation14], 0 }
  0x13   :  { %37 = vsyncpa [#allocation14 + $0x1], 0 }
  0x14   :  { %38 = vsyncpa [#allocation17], 0 }
  0x15   :  { %40 = vsyncpa [#allocation17 + $0x1], 0  ;;  %s2054_s22 = smov 0   ;;  %s2056_s23 = smov 0  }
  0x16   :  { %s2058_s8 = smov 0   ;;  %s2060_s24 = smov 0  }
  0x17 LB: > { %2659 = sst [smem:[#allocation24_spill]] %s1938_s22  ;;  %s2075_s9 = sadd.s32 4294967295, %s1950_s24   ;;  %s1950_s24 = sphi %s2060_s24, %s2691_s24   ;;  %s1946_s8 = sphi %s2058_s8, %s2696_s8   ;;  %s1942_s23 = sphi %s2056_s23, %s2695_s23   ;;  %s1938_s22 = sphi %s2054_s22, %s2694_s22  }
  0x18   : > { %2660 = sst [smem:[#allocation25_spill]] %s1946_s8  ;;  %s2637_s25 = sadd.s32 4294967294, %s1950_s24  }
  0x19   : > { %s2079_s26 = sadd.s32 1, %s1950_s24   ;;  %s53_s27 = sadd.s32 1, %s1946_s8 }
  0x1a   : > { %2661 = sst [smem:[#allocation26_spill]] %s2079_s26  ;;  %s50_s28 = ssub.s32 %s1950_s24, %s2079_s26 }
  0x1b   : > { %p60_p0 = scmp.ne.s32.totalorder %s1946_s8, %s1942_s23  ;;  %p51_p1 = scmp.eq.s32.totalorder %s50_s28, 0 }
  0x1c   : > { %p61_p2 = scmp.eq.s32.totalorder %s1950_s24, 0  ;;  %p66_p3 = scmp.ne.s32.totalorder %s1942_s23, %s1938_s22 }
  0x1d   : > { %p67_p4 = scmp.eq.s32.totalorder %s2075_s9, 0  ;;  %p284_p7 = scmp.eq.s32.totalorder %s2075_s9, 1 }
  0x1e   : > { %s2091_s29 = scalar_select %p51_p1, %s1946_s8, %s53_s27  }
  0x1f   : > { %p2093_p5 = por %p61_p2, %p60_p0  ;;  %p2097_p6 = por %p67_p4, %p66_p3 }
  0x20   : > { %2662 = sst [smem:[#allocation27_spill]] %s2091_s29  ;;  %p290_p8 = scmp.eq.s32.totalorder %s2637_s25, 1 }
  0x21   : > { %s2664_s16 = scalar_select %p2097_p6, 1, 0 }
  0x22   : > { %p1612_p10 = scmp.lt.s32.totalorder %s1950_s24, 2  ;;  %p2106_p11 = por %p284_p7, %p60_p0 }
  0x23   : > { %p2110_p12 = por %p290_p8, %p66_p3  ;;  %s2115_s19 = sand.u32 1, %s1946_s8  }
  0x24   : > { %s2665_s17 = scalar_select %p2106_p11, 1, 0 }
  0x25   : > { %s2666_s18 = scalar_select %p2110_p12, 1, 0 }
  0x26   : > { %s2643_s20 = sshll.u32 %s1950_s24, 10  ;;  %s2642_s21 = sshll.u32 %s2115_s19, 6 }
  0x27   : > { %2667 = sst [smem:[#allocation28_spill]] %s2666_s18  ;;  %s2668_s0 = sld [smem:[#allocation29_spill]] }
  0x28   : > { %s468_s29 = scalar_lea.vmem [#allocation4], %s2642_s21  ;;  %p2130_p13 = pnand %p1612_p10, %p2093_p5 }
  0x29   : > { %s475_s26 = sshll.u32 %s468_s29, 4  ;;  %s2134_s26 = int_to_ptr.vmem [resolvable:$true] %s475_s26 }
  0x2a   : > { %p1670_p1 = pneg %p2130_p13 }
  0x2d   : > { %s2124_s25 = scalar_lea.hbm %s2668_s0, %s2643_s20  ;;  %s1673_s30 = scalar_lea.hbm %s2668_s0, 2048 }
  0x2e   : > { %s1668_s27 = scalar_lea.hbm %s2124_s25, 1024  ;;  %p1674_p4 = scmp.lt.u32.totalorder %s2124_s25, %s2668_s0 }
  0x2f   : > { %p1669_p0 = scmp.ne.s32.totalorder %s2124_s25, %s1668_s27  ;;  %p1675_p5 = scmp.lt.u32.totalorder %s1673_s30, %s1668_s27 }
  0x30   : > { %p1677_p8 = scmp.lt.u32.totalorder %s1668_s27, %s2124_s25 }
  0x31   : > { %p1671_p2 = pnand %p1670_p1, %p1669_p0  ;;  %p1676_p7 = por %p1675_p5, %p1674_p4 }
  0x33   : > { %p1672_p3 = pneg %p1671_p2  ;;  %p1678_p10 = por %p1677_p8, %p1676_p7 }
  0x35   : > { %p1679_p9 = pnand %p1678_p10, %p1672_p3 }
  0x37   : > { %1682 = shalt.err (!%p1679_p9)
}
  0x38   : > { %s1683_s18 = scalar_lea.vmem %s2134_s26, 1024  ;;  %s1952_s28 = smov [#allocation4]  }
  0x39   : > { %p1684_p0 = scmp.ne.s32.totalorder %s2134_s26, %s1683_s18  ;;  %s1688_s29 = sshll.u32 %s1952_s28, 4  ;;  %s1689_s29 = int_to_ptr.vmem [resolvable:$false] %s1688_s29 }
  0x3a   : > { %s1690_s20 = scalar_lea.vmem %s1689_s29, 2048  ;;  %p1691_p11 = scmp.lt.s32.totalorder %s2134_s26, %s1689_s29 }
  0x3b   : > { %p1686_p2 = pnand %p1684_p0, %p1670_p1  ;;  %p1692_p4 = scmp.lt.s32.totalorder %s1690_s20, %s1683_s18 }
  0x3d   : > { %p1687_p12 = pneg %p1686_p2  ;;  %p1693_p5 = por %p1692_p4, %p1691_p11 }
  0x3f   : > { %p1694_p7 = pnand %p1693_p5, %p1687_p12 }
  0x41   : > { %1697 = shalt.err (!%p1694_p7)
}
  0x42   : > { %s2648_s21 = smov 256   ;;  %s1954_s27 = smov 16  }
  0x43   : > { %s2670_s18 = scalar_lea.sflag [#allocation5], %s2115_s19  ;;  %p1477_p9 = scmp.ge.s32.totalorder %s1950_s24, 1 }
  0x44   : > { %1589 = dma.hbm_to_vmem [thread:$0]  (!%p2130_p13), %s2124_s25, 1024, %s2134_s26, %s2670_s18, %s2648_s21, %s2648_s21, %s1954_s27  }
  0x45   : > { %p504_p11 = scmp.lt.s32.totalorder %s1950_s24, 3  ;;  %s2672_s28 = sshll.u32 %s1950_s24, 10 }
  0x46   : > { %s2673_s1 = sld [smem:[#allocation30_spill]]  ;;  %s2674_s22 = sshll.u32 %s2115_s19, 6 }
  0x47   : > { %p2169_p12 = pnand %p1477_p9, %p504_p11  ;;  %s489_s15 = scalar_lea.vmem [#allocation7], %s2674_s22 }
  0x48   : > { %s496_s14 = sshll.u32 %s489_s15, 4  ;;  %s486_s25 = scalar_lea.sflag [#allocation8], %s2115_s19  ;;  %s2182_s14 = int_to_ptr.vmem [resolvable:$true] %s496_s14 }
  0x4c   : > { %s2178_s0 = scalar_lea.hbm %s2673_s1, %s2672_s28  ;;  %s1703_s28 = scalar_lea.hbm %s2673_s1, 2048 }
  0x4d   : > { %s1698_s26 = scalar_lea.hbm %s2178_s0, 1024  ;;  %p1704_p0 = scmp.lt.u32.totalorder %s2178_s0, %s2673_s1 }
  0x4e   : > { %p1699_p3 = scmp.ne.s32.totalorder %s2178_s0, %s1698_s26  ;;  %p1705_p2 = scmp.lt.u32.totalorder %s1703_s28, %s1698_s26 }
  0x4f   : > { %p1707_p5 = scmp.lt.u32.totalorder %s1698_s26, %s2178_s0 }
  0x50   : > { %p1701_p8 = pnand %p1699_p3, %p1670_p1  ;;  %p1706_p4 = por %p1705_p2, %p1704_p0 }
  0x52   : > { %p1702_p10 = pneg %p1701_p8  ;;  %p1708_p7 = por %p1707_p5, %p1706_p4 }
  0x54   : > { %p1709_p9 = pnand %p1708_p7, %p1702_p10 }
  0x56   : > { %1712 = shalt.err (!%p1709_p9)
}
  0x57   : > { %s1713_s15 = scalar_lea.vmem %s2182_s14, 1024  ;;  %s1955_s22 = smov [#allocation7]  }
  0x58   : > { %p1714_p11 = scmp.ne.s32.totalorder %s2182_s14, %s1713_s15  ;;  %s1718_s18 = sshll.u32 %s1955_s22, 4  ;;  %s1719_s18 = int_to_ptr.vmem [resolvable:$false] %s1718_s18 }
  0x59   : > { %s1720_s21 = scalar_lea.vmem %s1719_s18, 2048  ;;  %p1721_p6 = scmp.lt.s32.totalorder %s2182_s14, %s1719_s18 }
  0x5a   : > { %p1716_p3 = pnand %p1714_p11, %p1670_p1  ;;  %p1722_p0 = scmp.lt.s32.totalorder %s1720_s21, %s1713_s15 }
  0x5c   : > { %p1717_p8 = pneg %p1716_p3  ;;  %p1723_p2 = por %p1722_p0, %p1721_p6 }
  0x5e   : > { %p1724_p4 = pnand %p1723_p2, %p1717_p8 }
  0x60   : > { %1727 = shalt.err (!%p1724_p4)
}
  0x61   : > { %s2675_s26 = smov 256   ;;  %508 = sbr.rel (%p2169_p12) target bundleno = 924 (0x39c), region = 60 }
  0x62   : > { %1592 = dma.hbm_to_vmem [thread:$0]  (!%p2130_p13), %s2178_s0, 1024, %s2182_s14, %s486_s25, %s2675_s26, %s2675_s26, %s1954_s27  }
  0x63   : > { %s2216_s29 = sand.u32 (!%p2169_p12), 1, %s1942_s23   ;;  %p2676_p6 = scmp.ne.s32.totalorder (!%p2169_p12), %s2664_s16, 0 }
  0x64   : > { %s2219_s28 = sshll.u32 (!%p2169_p12), %s2216_s29, 6  ;;  %s511_s8 = scalar_lea.sflag (!%p2169_p12), [#allocation5], %s2216_s29 }
  0x65   : > { %s514_s20 = scalar_lea.vmem (!%p2169_p12), [#allocation4], %s2219_s28 }
  0x68   : > { %1913 = dma.done.wait (%p2676_p6), %s511_s8, 1024  }
  0x69   : > { %1915 = vsyncadd (%p2676_p6), %s511_s8, 4294966272  ;;  %s520_s0 = scalar_lea.sflag [#allocation8], %s2216_s29  ;;  %s2229_s14 = scalar_lea.vmem [#allocation7], %s2219_s28 }
  0x6a   : > { %1917 = dma.done.wait (%p2676_p6), %s520_s0, 1024  }
  0x6b   : > { %1919 = vsyncadd (%p2676_p6), %s520_s0, 4294966272  ;;  %v1956_v0 = vmov 0.0   ;;  %v2235_v1 = vld [vmem:[%s514_s20 + $0x8] sm:$0xff]  ;;  %v2237_v2 = vld [vmem:[%s514_s20 + $0x18] sm:$0xff]  ;;  %s2677_s2 = sld [smem:[#allocation31_spill]]  ;;  %vm625_vm0 = vcmask 261120   ;;  %v775_v27 = vlaneseq }
  0x6c   : > { %693 = vmatprep.mubr.f32.mxu0 %v1956_v0  ;;  %768 = vmatprep.mubr.f32.mxu1 %v1956_v0  ;;  %v2239_v3 = vld [vmem:[%s514_s20] sm:$0xff]  ;;  %v1538_v4 = vpack.c.bf16 %v2237_v2, %v2235_v1  ;;  %v2243_v5 = vld [vmem:[%s514_s20 + $0x10] sm:$0xff]  ;;  %v2246_v6 = vld [vmem:[%s2229_s14 + $0x8] sm:$0xff]  ;;  %s2678_s3 = sld [smem:[#allocation32_spill]]  ;;  %s622_s25 = sld [smem:[#allocation2]]  ;;  %vm784_vm2 = vcmask 1040384  }
  0x6d   : > { %v2249_v7 = vld [vmem:[%s2229_s14 + $0x18] sm:$0xff]  ;;  %v1540_v8 = vpack.c.bf16 %v2243_v5, %v2239_v3  ;;  %v2256_v10 = vld [vmem:[%s2229_s14] sm:$0xff]  ;;  %v2259_v11 = vld [vmem:[%s2229_s14 + $0x10] sm:$0xff]  ;;  %s623_s15 = sld [smem:[#allocation3]]  ;;  %v776_v28 = vand.u32 127, %v775_v27  ;;  %s1482_s8 = sshll.u32 %s2216_s29, 5 }
  0x6e   : > { %v1546_v9 = vpack.c.bf16 %v2249_v7, %v2246_v6  ;;  %v2261_v12 = vld [vmem:[%s514_s20 + $0x28] sm:$0xff]  ;;  %1539 = vmatprep.subr.bf16.mxu0 %v1538_v4  ;;  %v1548_v13 = vpack.c.bf16 %v2259_v11, %v2256_v10  ;;  %v2265_v14 = vld [vmem:[%s514_s20 + $0x38] sm:$0xff]  ;;  %v2267_v15 = vld [vmem:[%s514_s20 + $0x20] sm:$0xff]  ;;  %s2338_s0 = scalar_lea.vmem [#allocation12], %s1482_s8  ;;  %s2679_s4 = sld [smem:[#allocation33_spill]] }
  0x6f   : > { %v2269_v16 = vld [vmem:[%s514_s20 + $0x30] sm:$0xff]  ;;  %1541 = vmatpush1.bf16.msra.mxu0 %v1540_v8  ;;  %v1542_v17 = vpack.c.bf16 %v2265_v14, %v2261_v12  ;;  %v2276_v19 = vld [vmem:[%s2229_s14 + $0x28] sm:$0xff]  ;;  %v2279_v20 = vld [vmem:[%s2229_s14 + $0x38] sm:$0xff]  ;;  %v777_v29 = vadd.s32 128, %v776_v28  ;;  %s2323_s20 = scalar_lea.vmem [#allocation9], %s2219_s28  ;;  %p2680_p1 = scmp.ne.s32.totalorder %s2665_s17, 0 }
  0x70   : > { %1547 = vmatprep.subr.bf16.mxu1 %v1546_v9  ;;  %v1544_v18 = vpack.c.bf16 %v2269_v16, %v2267_v15  ;;  %v2282_v21 = vld [vmem:[%s2229_s14 + $0x20] sm:$0xff]  ;;  %v1550_v22 = vpack.c.bf16 %v2279_v20, %v2276_v19  ;;  %v2287_v23 = vld [vmem:[%s2229_s14 + $0x30] sm:$0xff]  ;;  %s2347_s14 = scalar_lea.vmem [#allocation10], %s2219_s28  ;;  %s2363_s28 = scalar_lea.vmem [#allocation13], %s1482_s8 }
  0x71   : > { %1549 = vmatpush1.bf16.msra.mxu1 %v1548_v13  ;;  %1543 = vmatprep.subr.bf16.mxu0 %v1542_v17  ;;  %v1552_v24 = vpack.c.bf16 %v2287_v23, %v2282_v21  ;;  %v616_v25 = vld [vmem:[%s2677_s2] sm:$0x1]  ;;  %vm779_vm1 = vcmp.lt.s32.totalorder %v777_v29, 200  ;;  %s1158_s26 = sshll.u32 %s2347_s14, 4  ;;  %s1534_s8 = sshll.u32 %s2075_s9, 9  ;;  %s2388_s26 = int_to_ptr.vmem [resolvable:$true] %s1158_s26 }
  0x72   : > { %1551 = vmatprep.subr.bf16.mxu1 %v1550_v22  ;;  %v617_v26 = vld [vmem:[%s2678_s3] sm:$0x1]  ;;  %v624_v30 = vstv %s622_s25  ;;  %s2650_s25 = sand.u32 1, %s2075_s9   ;;  %s1728_s19 = scalar_lea.vmem %s2388_s26, 1024 }
  0x73   : > { %1545 = vmatpush1.bf16.msra.mxu0 %v1544_v18  ;;  %v700_v32 = vstv %s623_s15  ;;  %v620_v13 = vld [vmem:[%s2626_s5] sm:$0xff]  ;;  %v1957_v18 = vmov 0   ;;  %s2651_s15 = sshll.u32 %s2075_s9, 10  ;;  %s2393_s16 = scalar_lea.sflag [#allocation11], %s2650_s25 }
  0x74   : > { %v621_v17 = vld [vmem:[%s2628_s7] sm:$0xff]  ;;  %1655 = vset.pattern.permute.xlu1 %v1957_v18  ;;  %1654 = vset.pattern.permute.xlu0 %v1957_v18  ;;  %s2385_s21 = scalar_lea.hbm %s2632_s11, %s2651_s15  ;;  %p1729_p13 = scmp.ne.s32.totalorder %s2388_s26, %s1728_s19 }
  0x75   : > { %1553 = vmatpush1.bf16.msra.mxu1 %v1552_v24  ;;  %s1958_s27 = smov [#allocation10]  }
  0x76   : > { %1486 = vmatmul.mubr.msk.f32.vlgmr.msra.gmra.mrb[0].mxu0 %vm625_vm0, %v616_v25  ;;  %v824_v25 = vshrl.u32 %v775_v27, 7  ;;  %p1730_p12 = pnand %p1729_p13, %p2680_p1  ;;  %s1732_s30 = sshll.u32 %s1958_s27, 4  ;;  %s1733_s30 = int_to_ptr.vmem [resolvable:$false] %s1732_s30 }
  0x77   : > { %999 = vmatprep.mubr.f32.mxu0 %v1956_v0  ;;  %s1734_s22 = scalar_lea.vmem %s1733_s30, 2048  ;;  %p1735_p5 = scmp.lt.s32.totalorder %s2388_s26, %s1733_s30 }
  0x78   : > { %1487 = vmatmul.mubr.msk.f32.vlgmr.msra.gmra.mrb[0].mxu1 %vm625_vm0, %v617_v26  ;;  %v825_v26 = vsub.s32 0, %v824_v25  ;;  %p1731_p10 = pneg %p1730_p12  ;;  %p1736_p7 = scmp.lt.s32.totalorder %s1734_s22, %s1728_s19 }
  0x79   : > { %1078 = vmatprep.mubr.f32.mxu1 %v1956_v0 }
  0x7a   : > { %p1737_p9 = por %p1736_p7, %p1735_p5 }
  0x7c   : > { %p1738_p11 = pnand %p1737_p9, %p1731_p10 }
 0x149   : > { %v695_v31 = vpop.f32.mrb[0].mxu0 }
 0x14a   : > { %v696_v33 = vadd.f32 %v695_v31, %v624_v30  ;;  %v697_v34 = vpop.f32.mrb[1].mxu0 }
 0x14b   : > { %v770_v35 = vpop.f32.mrb[0].mxu1  ;;  %v698_v36 = vadd.f32 %v697_v34, %v624_v30 }
 0x14c   : > { %v772_v37 = vpop.f32.mrb[1].mxu1  ;;  %v771_v38 = vadd.f32 %v770_v35, %v700_v32  ;;  %v785_v42 = vsel %vm784_vm2, %v696_v33, -inf }
 0x14d   : > { %v773_v39 = vadd.f32 %v772_v37, %v700_v32  ;;  %v781_v40 = vsel %vm779_vm1, %v698_v36, -1e+30 }
 0x14e   : > { %v786_v43 = vsel %vm784_vm2, %v781_v40, -inf  ;;  %v796_v45 = vsel %vm784_vm2, %v771_v38, -inf }
 0x14f   : > { %v783_v41 = vsel %vm779_vm1, %v773_v39, -1e+30  ;;  %v787_v44 = vmax.f32 %v785_v42, %v786_v43 }
 0x150   : > { %v797_v46 = vsel %vm784_vm2, %v783_v41, -inf }
 0x151   : > { %788 = vmax.xlane.f32.xlu0 %v787_v44  ;;  %v798_v47 = vmax.f32 %v796_v45, %v797_v46 }
 0x155   : > { %799 = vmax.xlane.f32.xlu0 %v798_v47 }
 0x16b   : > { %929 = vperm.xlu0 %1654, %v620_v13  }
 0x1de   : > { %v789_v48 = vpop.xlane.xlu0 %788 }
 0x1df   : > { %v790_v49 = vsub.f32 %v696_v33, %v789_v48  ;;  %v791_v50 = vsub.f32 %v781_v40, %v789_v48 }
 0x1e1   : > { %v792_v51 = vmul.f32 1.442695, %v790_v49  ;;  %v794_v52 = vmul.f32 1.442695, %v791_v50 }
 0x1e2   : > { %v800_v53 = vpop.xlane.xlu0 %799 }
 0x1e3   : > { %1656 = vpow2.f32 %v792_v51  ;;  %v801_v54 = vsub.f32 %v771_v38, %v800_v53  ;;  %v802_v55 = vsub.f32 %v783_v41, %v800_v53 }
 0x1e4   : > { %1658 = vpow2.f32 %v794_v52 }
 0x1e5   : > { %v803_v56 = vmul.f32 1.442695, %v801_v54  ;;  %v805_v57 = vmul.f32 1.442695, %v802_v55  ;;  %v619_v54 = vld [vmem:[%s2627_s6] sm:$0xff] }
 0x1e7   : > { %1660 = vpow2.f32 %v803_v56 }
 0x1e8   : > { %1662 = vpow2.f32 %v805_v57 }
 0x1ed   : > { %v1657_v58 = vpop.eup %1656 }
 0x1ee   : > { %v1659_v59 = vpop.eup %1658  ;;  %v807_v60 = vsel %vm784_vm2, %v1657_v58, 0.0 }
 0x1ef   : > { %v808_v61 = vsel %vm784_vm2, %v1659_v59, 0.0 }
 0x1f0   : > { %v809_v62 = vadd.f32 %v808_v61, %v807_v60 }
 0x1f1   : > { %v1661_v63 = vpop.eup %1660 }
 0x1f2   : > { %v1663_v0 = vpop.eup %1662  ;;  %810 = vadd.xlane.f32.xlu1 %v809_v62  ;;  %v815_v4 = vsel %vm784_vm2, %v1661_v63, 0.0 }
 0x1f3   : > { %v816_v8 = vsel %vm784_vm2, %v1663_v0, 0.0 }
 0x1f4   : > { %v817_v9 = vadd.f32 %v816_v8, %v815_v4 }
 0x1f6   : > { %818 = vadd.xlane.f32.xlu1 %v817_v9 }
 0x207   : > { %1008 = vperm.xlu1 %1655, %v621_v17  }
 0x27f   : > { %v811_v22 = vpop.xlane.xlu1 %810 }
 0x280   : > { %1664 = vrcp.f32 %v811_v22 }
 0x283   : > { %v819_v24 = vpop.xlane.xlu1 %818 }
 0x284   : > { %1666 = vrcp.f32 %v819_v24 }
 0x28a   : > { %v1665_v28 = vpop.eup %1664 }
 0x28b   : > { %v813_v29 = vmul.f32 %v1665_v28, %v1657_v58  ;;  %v814_v30 = vmul.f32 %v1665_v28, %v1659_v59 }
 0x28d   : > { %v826_v31 = vrot.slane %v813_v29, %v825_v26  ;;  %v830_v32 = vrot.slane %v814_v30, %v825_v26 }
 0x28e   : > { %v1667_v33 = vpop.eup %1666 }
 0x28f   : > { %v821_v34 = vmul.f32 %v1667_v33, %v1661_v63  ;;  %v822_v35 = vmul.f32 %v1667_v33, %v1663_v0  ;;  %v832_v36 = vmul.f32 %v830_v32, %v2235_v1  ;;  %v834_v37 = vmul.f32 %v830_v32, %v2237_v2 }
 0x290   : > { %v831_v38 = vmul.f32 %v826_v31, %v2239_v3  ;;  %v833_v39 = vmul.f32 %v826_v31, %v2243_v5  ;;  %v836_v27 = vmul.f32 %v830_v32, %v2261_v12  ;;  %v838_v40 = vmul.f32 %v830_v32, %v2265_v14 }
 0x291   : > { %v842_v41 = vrot.slane %v821_v34, %v825_v26  ;;  %v846_v42 = vrot.slane %v822_v35, %v825_v26  ;;  %856 = vst [vmem:[%s2323_s20 + $0x8] sm:$0xff] %v832_v36  ;;  %858 = vst [vmem:[%s2323_s20 + $0x18] sm:$0xff] %v834_v37  ;;  %v1554_v1 = vpack.c.bf16 %v834_v37, %v832_v36 }
 0x292   : > { %v835_v2 = vmul.f32 %v826_v31, %v2267_v15  ;;  %855 = vst [vmem:[%s2323_s20] sm:$0xff] %v831_v38  ;;  %857 = vst [vmem:[%s2323_s20 + $0x10] sm:$0xff] %v833_v39  ;;  %v1522_v3 = vpack.c.bf16 %v832_v36, %v831_v38  ;;  %v1523_v5 = vpack.c.bf16 %v834_v37, %v833_v39 }
 0x293   : > { %v1556_v12 = vpack.c.bf16 %v833_v39, %v831_v38  ;;  %860 = vst [vmem:[%s2323_s20 + $0x28] sm:$0xff] %v836_v27  ;;  %862 = vst [vmem:[%s2323_s20 + $0x38] sm:$0xff] %v838_v40  ;;  %v1558_v14 = vpack.c.bf16 %v838_v40, %v836_v27  ;;  %1555 = vmatprep.subr.bf16.mxu0 %v1554_v1  ;;  %v848_v43 = vmul.f32 %v846_v42, %v2246_v6 }
 0x294   : > { %v850_v44 = vmul.f32 %v846_v42, %v2249_v7  ;;  %v837_v45 = vmul.f32 %v826_v31, %v2269_v16  ;;  %859 = vst [vmem:[%s2323_s20 + $0x20] sm:$0xff] %v835_v2  ;;  %v1524_v46 = vpack.c.bf16 %v836_v27, %v835_v2  ;;  %895 = vst [vmem:[%s2338_s0] sm:$0xff] %v1522_v3 }
 0x295   : > { %896 = vst [vmem:[%s2338_s0 + $0x8] sm:$0xff] %v1523_v5  ;;  %1557 = vmatpush1.bf16.msra.mxu0 %v1556_v12  ;;  %v847_v15 = vmul.f32 %v842_v41, %v2256_v10  ;;  %v849_v6 = vmul.f32 %v842_v41, %v2259_v11  ;;  %v852_v7 = vmul.f32 %v846_v42, %v2276_v19  ;;  %864 = vst [vmem:[%s2347_s14 + $0x8] sm:$0xff] %v848_v43 }
 0x296   : > { %v854_v16 = vmul.f32 %v846_v42, %v2279_v20  ;;  %1559 = vmatprep.subr.bf16.mxu0 %v1558_v14  ;;  %866 = vst [vmem:[%s2347_s14 + $0x18] sm:$0xff] %v850_v44  ;;  %v1562_v47 = vpack.c.bf16 %v850_v44, %v848_v43  ;;  %861 = vst [vmem:[%s2323_s20 + $0x30] sm:$0xff] %v837_v45  ;;  %v1525_v10 = vpack.c.bf16 %v838_v40, %v837_v45 }
 0x297   : > { %897 = vst [vmem:[%s2338_s0 + $0x10] sm:$0xff] %v1524_v46  ;;  %v851_v11 = vmul.f32 %v842_v41, %v2282_v21  ;;  %v1560_v19 = vpack.c.bf16 %v837_v45, %v835_v2  ;;  %863 = vst [vmem:[%s2347_s14] sm:$0xff] %v847_v15  ;;  %v1526_v20 = vpack.c.bf16 %v848_v43, %v847_v15  ;;  %v618_v21 = vld [vmem:[%s2679_s4] sm:$0xff] }
 0x298   : > { %865 = vst [vmem:[%s2347_s14 + $0x10] sm:$0xff] %v849_v6  ;;  %v1527_v48 = vpack.c.bf16 %v850_v44, %v849_v6  ;;  %v1564_v49 = vpack.c.bf16 %v849_v6, %v847_v15  ;;  %868 = vst [vmem:[%s2347_s14 + $0x28] sm:$0xff] %v852_v7  ;;  %1563 = vmatprep.subr.bf16.mxu1 %v1562_v47  ;;  %v1566_v50 = vpack.c.bf16 %v854_v16, %v852_v7 }
 0x299   : > { %870 = vst [vmem:[%s2347_s14 + $0x38] sm:$0xff] %v854_v16  ;;  %898 = vst [vmem:[%s2338_s0 + $0x18] sm:$0xff] %v1525_v10  ;;  %v853_v51 = vmul.f32 %v842_v41, %v2287_v23  ;;  %v1528_v52 = vpack.c.bf16 %v852_v7, %v851_v11  ;;  %1561 = vmatpush1.bf16.msra.mxu0 %v1560_v19 }
 0x29a   : > { %867 = vst [vmem:[%s2347_s14 + $0x20] sm:$0xff] %v851_v11  ;;  %923 = vst [vmem:[%s2363_s28] sm:$0xff] %v1526_v20  ;;  %1565 = vmatpush1.bf16.msra.mxu1 %v1564_v49 }
 0x29b   : > { %924 = vst [vmem:[%s2363_s28 + $0x8] sm:$0xff] %v1527_v48  ;;  %1567 = vmatprep.subr.bf16.mxu1 %v1566_v50  ;;  %869 = vst [vmem:[%s2347_s14 + $0x30] sm:$0xff] %v853_v51  ;;  %v1529_v23 = vpack.c.bf16 %v854_v16, %v853_v51  ;;  %v1568_v53 = vpack.c.bf16 %v853_v51, %v851_v11 }
 0x29c   : > { %925 = vst [vmem:[%s2363_s28 + $0x10] sm:$0xff] %v1528_v52  ;;  %1496 = vmatmul.mubr.msk.f32.vlgmr.msra.gmra.mrb[2].mxu0 %vm625_vm0, %v618_v21 }
 0x29d   : > { %926 = vst [vmem:[%s2363_s28 + $0x18] sm:$0xff] %v1529_v23 }
 0x29e   : > { %1569 = vmatpush1.bf16.msra.mxu1 %v1568_v53 }
 0x2a1   : > { %1497 = vmatmul.mubr.msk.f32.vlgmr.msra.gmra.mrb[2].mxu1 %vm625_vm0, %v619_v54 }
 0x2a2   : > { %1741 = shalt.err (!%p1738_p11)
}
 0x2a3   : > { %s1742_s14 = scalar_lea.hbm %s2385_s21, 1024  ;;  %s1746_s27 = scalar_lea.hbm %s2632_s11, 2048 }
 0x2a4   : > { %p1743_p3 = scmp.ne.s32.totalorder %s2385_s21, %s1742_s14  ;;  %p1747_p2 = scmp.lt.u32.totalorder %s2385_s21, %s2632_s11 }
 0x2a5   : > { %p1748_p4 = scmp.lt.u32.totalorder %s1746_s27, %s1742_s14  ;;  %p1750_p13 = scmp.lt.u32.totalorder %s1742_s14, %s2385_s21 }
 0x2a6   : > { %p1744_p8 = pnand %p1743_p3, %p2680_p1 }
 0x2a7   : > { %p1749_p6 = por %p1748_p4, %p1747_p2 }
 0x2a8   : > { %p1745_p0 = pneg %p1744_p8 }
 0x2a9   : > { %p1751_p12 = por %p1750_p13, %p1749_p6 }
 0x2ab   : > { %p1752_p10 = pnand %p1751_p12, %p1745_p0 }
 0x2ad   : > { %1755 = shalt.err (!%p1752_p10)
}
 0x2ae   : > { %s1959_s19 = smov 256   ;;  %s1960_s25 = smov 16  }
 0x2af   : > { %1575 = dma.vmem_to_hbm [thread:$0]  (%p2680_p1), %s2388_s26, 1024, %s2385_s21, %s2393_s16, %s1959_s19, %s1959_s19, %s1960_s25  }
 0x2b0   : > { %s2425_s14 = scalar_lea.hbm %s2633_s12, %s1534_s8  ;;  %s2432_s30 = scalar_lea.hbm %s2634_s13, %s1534_s8 }
 0x2b1   : > { %s1190_s1 = sshll.u32 %s2363_s28, 4  ;;  %s2681_s2 = sshll.u32 %s2075_s9, 10  ;;  %s2435_s1 = int_to_ptr.vmem [resolvable:$true] %s1190_s1 }
 0x2b2   : > { %s2442_s21 = scalar_lea.hbm %s2631_s10, %s2681_s2  ;;  %s2682_s26 = sand.u32 1, %s2075_s9  }
 0x2b3   : > { %s2446_s15 = scalar_lea.sflag [#allocation14], %s2682_s26  ;;  %s1756_s22 = scalar_lea.vmem %s2435_s1, 512 }
 0x2b4   : > { %p1757_p5 = scmp.ne.s32.totalorder %s2435_s1, %s1756_s22  ;;  %s1961_s28 = smov [#allocation13]  }
 0x2b5   : > { %s1760_s8 = sshll.u32 %s1961_s28, 4  ;;  %s1761_s8 = int_to_ptr.vmem [resolvable:$false] %s1760_s8 }
 0x2b6   : > { %p1758_p7 = pnand %p1757_p5, %p2680_p1  ;;  %s1762_s18 = scalar_lea.vmem %s1761_s8, 1024 }
 0x2b7   : > { %p1763_p11 = scmp.lt.s32.totalorder %s2435_s1, %s1761_s8  ;;  %p1764_p3 = scmp.lt.s32.totalorder %s1762_s18, %s1756_s22 }
 0x2b8   : > { %p1759_p9 = pneg %p1758_p7 }
 0x2b9   : > { %p1765_p8 = por %p1764_p3, %p1763_p11 }
 0x2bb   : > { %p1766_p0 = pnand %p1765_p8, %p1759_p9 }
 0x2bd   : > { %1769 = shalt.err (!%p1766_p0)
}
 0x2be   : > { %s1770_s2 = scalar_lea.hbm %s2432_s30, 512  ;;  %s1774_s27 = scalar_lea.hbm %s2634_s13, 1024 }
 0x2bf   : > { %p1771_p2 = scmp.ne.s32.totalorder %s2432_s30, %s1770_s2  ;;  %p1775_p13 = scmp.lt.u32.totalorder %s2432_s30, %s2634_s13 }
 0x2c0   : > { %p1776_p12 = scmp.lt.u32.totalorder %s1774_s27, %s1770_s2  ;;  %p1778_p5 = scmp.lt.u32.totalorder %s1770_s2, %s2432_s30 }
 0x2c1   : > { %p1772_p4 = pnand %p1771_p2, %p2680_p1 }
 0x2c2   : > { %p1777_p10 = por %p1776_p12, %p1775_p13 }
 0x2c3   : > { %p1773_p6 = pneg %p1772_p4 }
 0x2c4   : > { %p1779_p7 = por %p1778_p5, %p1777_p10 }
 0x2c6   : > { %p1780_p9 = pnand %p1779_p7, %p1773_p6 }
 0x2c8   : > { %1783 = shalt.err (!%p1780_p9)
}
 0x2c9   : > { %s1962_s22 = smov 128   ;;  %s1963_s8 = smov 8  }
 0x2ca   : > { %1577 = dma.vmem_to_hbm [thread:$0]  (%p2680_p1), %s2435_s1, 512, %s2432_s30, %s2446_s15, %s1962_s22, %s1962_s22, %s1963_s8  }
 0x2cb   : > { %s1142_s18 = sshll.u32 %s2323_s20, 4  ;;  %s1174_s2 = sshll.u32 %s2338_s0, 4  ;;  %s2475_s18 = int_to_ptr.vmem [resolvable:$true] %s1142_s18  ;;  %s2477_s2 = int_to_ptr.vmem [resolvable:$true] %s1174_s2 }
 0x2cc   : > { %s1104_s3 = scalar_lea.sflag [#allocation6], %s2216_s29  ;;  %s1784_s4 = scalar_lea.vmem %s2475_s18, 1024 }
 0x2cd   : > { %p1785_p11 = scmp.ne.s32.totalorder %s2475_s18, %s1784_s4  ;;  %s1964_s27 = smov [#allocation9]  }
 0x2ce   : > { %s1788_s26 = sshll.u32 %s1964_s27, 4  ;;  %s1789_s26 = int_to_ptr.vmem [resolvable:$false] %s1788_s26 }
 0x2cf   : > { %p1786_p3 = pnand %p1785_p11, %p2680_p1  ;;  %s1790_s28 = scalar_lea.vmem %s1789_s26, 2048 }
 0x2d0   : > { %p1791_p0 = scmp.lt.s32.totalorder %s2475_s18, %s1789_s26  ;;  %p1792_p2 = scmp.lt.s32.totalorder %s1790_s28, %s1784_s4 }
 0x2d1   : > { %p1787_p8 = pneg %p1786_p3 }
 0x2d2   : > { %p1793_p4 = por %p1792_p2, %p1791_p0 }
 0x2d4   : > { %p1794_p6 = pnand %p1793_p4, %p1787_p8 }
 0x2d6   : > { %1797 = shalt.err (!%p1794_p6)
}
 0x2d7   : > { %s1798_s1 = scalar_lea.hbm %s2442_s21, 1024  ;;  %s1802_s30 = scalar_lea.hbm %s2631_s10, 2048 }
 0x2d8   : > { %p1799_p13 = scmp.ne.s32.totalorder %s2442_s21, %s1798_s1  ;;  %p1803_p5 = scmp.lt.u32.totalorder %s2442_s21, %s2631_s10 }
 0x2d9   : > { %p1804_p7 = scmp.lt.u32.totalorder %s1802_s30, %s1798_s1  ;;  %p1806_p11 = scmp.lt.u32.totalorder %s1798_s1, %s2442_s21 }
 0x2da   : > { %p1800_p12 = pnand %p1799_p13, %p2680_p1 }
 0x2db   : > { %p1805_p9 = por %p1804_p7, %p1803_p5 }
 0x2dc   : > { %p1801_p10 = pneg %p1800_p12 }
 0x2dd   : > { %p1807_p3 = por %p1806_p11, %p1805_p9 }
 0x2df   : > { %p1808_p8 = pnand %p1807_p3, %p1801_p10 }
 0x2e1   : > { %1811 = shalt.err (!%p1808_p8)
}
 0x2e2   : > { %1574 = dma.vmem_to_hbm [thread:$0]  (%p2680_p1), %s2475_s18, 1024, %s2442_s21, %s1104_s3, %s1959_s19, %s1959_s19, %s1960_s25  }
 0x2e3   : > { %s1812_s4 = scalar_lea.vmem %s2477_s2, 512  ;;  %s1965_s28 = smov [#allocation12]  }
 0x2e4   : > { %p1813_p0 = scmp.ne.s32.totalorder %s2477_s2, %s1812_s4  ;;  %s1816_s1 = sshll.u32 %s1965_s28, 4  ;;  %s1817_s1 = int_to_ptr.vmem [resolvable:$false] %s1816_s1 }
 0x2e5   : > { %s1818_s20 = scalar_lea.vmem %s1817_s1, 1024  ;;  %p1819_p6 = scmp.lt.s32.totalorder %s2477_s2, %s1817_s1 }
 0x2e6   : > { %p1814_p2 = pnand %p1813_p0, %p2680_p1  ;;  %p1820_p13 = scmp.lt.s32.totalorder %s1818_s20, %s1812_s4 }
 0x2e8   : > { %p1815_p4 = pneg %p1814_p2  ;;  %p1821_p12 = por %p1820_p13, %p1819_p6 }
 0x2ea   : > { %p1822_p10 = pnand %p1821_p12, %p1815_p4 }
 0x2ec   : > { %1825 = shalt.err (!%p1822_p10)
}
 0x2ed   : > { %s1826_s19 = scalar_lea.hbm %s2425_s14, 512  ;;  %s1830_s18 = scalar_lea.hbm %s2633_s12, 1024 }
 0x2ee   : > { %p1827_p5 = scmp.ne.s32.totalorder %s2425_s14, %s1826_s19  ;;  %p1831_p11 = scmp.lt.u32.totalorder %s2425_s14, %s2633_s12 }
 0x2ef   : > { %p1832_p3 = scmp.lt.u32.totalorder %s1830_s18, %s1826_s19  ;;  %p1834_p0 = scmp.lt.u32.totalorder %s1826_s19, %s2425_s14 }
 0x2f0   : > { %p1828_p7 = pnand %p1827_p5, %p2680_p1 }
 0x2f1   : > { %p1833_p8 = por %p1832_p3, %p1831_p11 }
 0x2f2   : > { %p1829_p9 = pneg %p1828_p7 }
 0x2f3   : > { %p1835_p2 = por %p1834_p0, %p1833_p8 }
 0x2f5   : > { %p1836_p4 = pnand %p1835_p2, %p1829_p9 }
 0x2f7   : > { %1839 = shalt.err (!%p1836_p4)
}
 0x2f8   : > { %1576 = dma.vmem_to_hbm [thread:$0]  (%p2680_p1), %s2477_s2, 512, %s2425_s14, %s2393_s16, %s1962_s22, %s1962_s22, %s1963_s8   ;;  %v930_v55 = vpop.permute.xlu0 %929  ;;  %v1009_v59 = vpop.permute.xlu1 %1008 }
 0x2f9   : > { %s1484_s30 = sshll.u32 %s2216_s29, 3  ;;  %s1536_s27 = sshll.u32 %s2075_s9, 7 }
 0x2fa   : > { %s592_s26 = scalar_lea.vmem [#allocation15], %s1484_s30  ;;  %s2683_s20 = sld [smem:[#allocation34_spill]] }
 0x2fb   : > { %s1207_s4 = sshll.u32 %s592_s26, 4  ;;  %s2542_s16 = scalar_lea.vmem [#allocation16], %s1484_s30  ;;  %s2540_s4 = int_to_ptr.vmem [resolvable:$true] %s1207_s4 }
 0x2fc   : > { %s1221_s14 = sshll.u32 %s2542_s16, 4  ;;  %s1840_s22 = scalar_lea.vmem %s2540_s4, 128  ;;  %s2576_s14 = int_to_ptr.vmem [resolvable:$true] %s1221_s14 }
 0x2fd   : > { %p1841_p6 = scmp.ne.s32.totalorder %s2540_s4, %s1840_s22  ;;  %s1966_s8 = smov [#allocation15]  }
 0x2fe   : > { %s1844_s2 = sshll.u32 %s1966_s8, 4  ;;  %s1845_s2 = int_to_ptr.vmem [resolvable:$false] %s1844_s2 }
 0x2ff   : > { %p1842_p13 = pnand %p1841_p6, %p2680_p1  ;;  %s1846_s25 = scalar_lea.vmem %s1845_s2, 256 }
 0x300   : > { %s2538_s19 = scalar_lea.hbm %s2683_s20, %s1536_s27  ;;  %p1847_p10 = scmp.lt.s32.totalorder %s2540_s4, %s1845_s2 }
 0x301   : > { %p1843_p12 = pneg %p1842_p13  ;;  %p1848_p5 = scmp.lt.s32.totalorder %s1846_s25, %s1840_s22 }
 0x303   : > { %p1849_p7 = por %p1848_p5, %p1847_p10 }
 0x305   : > { %p1850_p9 = pnand %p1849_p7, %p1843_p12 }
 0x36f   : > { %v1001_v56 = vpop.f32.mrb[2].mxu0 }
 0x370   : > { %v1003_v57 = vpop.f32.mrb[3].mxu0  ;;  %v1002_v58 = vadd.f32 %v1001_v56, %v930_v55 }
 0x371   : > { %v1004_v60 = vadd.f32 %v1003_v57, %v930_v55 }
 0x373   : > { %v1530_v62 = vpack.c.bf16 %v1004_v60, %v1002_v58 }
 0x374   : > { %v1080_v61 = vpop.f32.mrb[2].mxu1 }
 0x375   : > { %v1081_v63 = vadd.f32 %v1080_v61, %v1009_v59  ;;  %v1082_v0 = vpop.f32.mrb[3].mxu1  ;;  %1093 = vst [vmem:[%s592_s26] sm:$0xff] %v1530_v62 }
 0x376   : > { %v1083_v4 = vadd.f32 %v1082_v0, %v1009_v59 }
 0x377   : > { %1853 = shalt.err (!%p1850_p9)
}
 0x378   : > { %s1854_s21 = scalar_lea.hbm %s2538_s19, 128  ;;  %s1858_s0 = scalar_lea.hbm %s2683_s20, 256 }
 0x379   : > { %p1855_p11 = scmp.ne.s32.totalorder %s2538_s19, %s1854_s21  ;;  %p1859_p0 = scmp.lt.u32.totalorder %s2538_s19, %s2683_s20 }
 0x37a   : > { %p1860_p2 = scmp.lt.u32.totalorder %s1858_s0, %s1854_s21  ;;  %p1862_p6 = scmp.lt.u32.totalorder %s1854_s21, %s2538_s19 }
 0x37b   : > { %p1856_p3 = pnand %p1855_p11, %p2680_p1 }
 0x37c   : > { %p1861_p4 = por %p1860_p2, %p1859_p0 }
 0x37d   : > { %p1857_p8 = pneg %p1856_p3 }
 0x37e   : > { %p1863_p13 = por %p1862_p6, %p1861_p4 }
 0x380   : > { %p1864_p12 = pnand %p1863_p13, %p1857_p8 }
 0x382   : > { %1867 = shalt.err (!%p1864_p12)
}
 0x383   : > { %1578 = dma.vmem_to_hbm [thread:$0]  (%p2680_p1), %s2540_s4, 128, %s2538_s19, %s2446_s15   ;;  %v1531_v8 = vpack.c.bf16 %v1083_v4, %v1081_v63 }
 0x384   : > { %s2684_s22 = sld [smem:[#allocation35_spill]]  ;;  %s1129_s25 = scalar_lea.sflag [#allocation17], %s2216_s29 }
 0x385   : > { %1102 = vst [vmem:[%s2542_s16] sm:$0xff] %v1531_v8  ;;  %s1868_s21 = scalar_lea.vmem %s2576_s14, 128  ;;  %s1967_s15 = smov [#allocation16]  }
 0x386   : > { %p1869_p10 = scmp.ne.s32.totalorder %s2576_s14, %s1868_s21  ;;  %s1872_s9 = sshll.u32 %s1967_s15, 4  ;;  %s1873_s9 = int_to_ptr.vmem [resolvable:$false] %s1872_s9 }
 0x387   : > { %s1874_s4 = scalar_lea.vmem %s1873_s9, 256  ;;  %p1875_p9 = scmp.lt.s32.totalorder %s2576_s14, %s1873_s9 }
 0x388   : > { %p1870_p5 = pnand %p1869_p10, %p2680_p1  ;;  %p1876_p11 = scmp.lt.s32.totalorder %s1874_s4, %s1868_s21 }
 0x38a   : > { %s2685_s2 = smov %s2684_s22  ;;  %s2572_s8 = scalar_lea.hbm %s2684_s22, %s1536_s27 }
 0x38b   : > { %p1871_p7 = pneg %p1870_p5  ;;  %p1877_p3 = por %p1876_p11, %p1875_p9 }
 0x38d   : > { %p1878_p8 = pnand %p1877_p3, %p1871_p7 }
 0x38f   : > { %1881 = shalt.err (!%p1878_p8)
}
 0x390   : > { %s1882_s29 = scalar_lea.hbm %s2572_s8, 128  ;;  %s1886_s16 = scalar_lea.hbm %s2685_s2, 256 }
 0x391   : > { %p1883_p0 = scmp.ne.s32.totalorder %s2572_s8, %s1882_s29  ;;  %p1887_p6 = scmp.lt.u32.totalorder %s2572_s8, %s2685_s2 }
 0x392   : > { %p1888_p13 = scmp.lt.u32.totalorder %s1886_s16, %s1882_s29  ;;  %p1890_p10 = scmp.lt.u32.totalorder %s1882_s29, %s2572_s8 }
 0x393   : > { %p1884_p2 = pnand %p1883_p0, %p2680_p1 }
 0x394   : > { %p1889_p12 = por %p1888_p13, %p1887_p6 }
 0x395   : > { %p1885_p4 = pneg %p1884_p2 }
 0x396   : > { %p1891_p5 = por %p1890_p10, %p1889_p12 }
 0x398   : > { %p1892_p7 = pnand %p1891_p5, %p1885_p4 }
 0x39a   : > { %1895 = shalt.err (!%p1892_p7)
}
 0x39b   : > { %1579 = dma.vmem_to_hbm [thread:$0]  (%p2680_p1), %s2576_s14, 128, %s2572_s8, %s1129_s25  }
 0x39c PF: > { %s2686_s0 = sld [smem:[#allocation24_spill]]  ;;  %s2687_s30 = sld [smem:[#allocation28_spill]] }
 0x39d   : > { %p2689_p11 = scmp.ge.s32.totalorder %s1950_s24, 2 }
 0x3a2   : > { %s1233_s26 = sand.u32 1, %s2686_s0   ;;  %p2688_p9 = scmp.ne.s32.totalorder %s2687_s30, 0 }
 0x3a3   : > { %s1234_s28 = scalar_lea.sflag [#allocation6], %s1233_s26 }
 0x3a4   : > { %p1594_p3 = pnand %p2689_p11, %p2688_p9 }
 0x3a6   : > { %1921 = dma.done.wait (!%p1594_p3), %s1234_s28, 1024  }
 0x3a7   : > { %1923 = vsyncadd (!%p1594_p3), %s1234_s28, 4294966272  ;;  %s2690_s1 = sadd.s32 4294967294, %s1950_s24  }
 0x3a8   : > { %s1242_s22 = sand.u32 1, %s2690_s1  }
 0x3a9   : > { %s1243_s21 = scalar_lea.sflag [#allocation11], %s1242_s22 }
 0x3aa   : > { %1925 = dma.done.wait (!%p1594_p3), %s1243_s21, 1536  }
 0x3ab   : > { %1927 = vsyncadd (!%p1594_p3), %s1243_s21, 4294965760  ;;  %s1261_s17 = scalar_lea.sflag [#allocation14], %s1242_s22 }
 0x3ac   : > { %1929 = dma.done.wait (!%p1594_p3), %s1261_s17, 640  }
 0x3ad   : > { %1931 = vsyncadd (!%p1594_p3), %s1261_s17, 4294966656  ;;  %s1279_s14 = scalar_lea.sflag [#allocation17], %s1233_s26 }
 0x3ae   : > { %1933 = dma.done.wait (!%p1594_p3), %s1279_s14, 128  }
 0x3af   : > { %1935 = vsyncadd (!%p1594_p3), %s1279_s14, 4294967168  ;;  %s2691_s24 = sld [smem:[#allocation26_spill]]  ;;  %s2692_s8 = sld [smem:[#allocation25_spill]] }
 0x3b0   : > { %s2693_s25 = sld [smem:[#allocation27_spill]]  ;;  %s2694_s22 = smov %s1942_s23 }
 0x3b5   : > { %p43_p1 = scmp.ge.s32.totalorder %s2691_s24, 4   ;;  %s2695_s23 = smov %s2692_s8 }
 0x3b6   : > { %s2696_s8 = smov %s2693_s25 }
 0x3b7   :  { %45 = sbr.rel (!%p43_p1) target bundleno = 23 (0x17), region = 199 }
 0x3be   :  { %1284 = vsyncpa [#allocation5], 1 }
 0x3bf   :  { %1286 = vsyncpa [#allocation5 + $0x1], 1 }
 0x3c0   :  { %1287 = vsyncpa [#allocation8], 1 }
 0x3c1   :  { %1289 = vsyncpa [#allocation8 + $0x1], 1 }
 0x3c2   :  { %1290 = vsyncpa [#allocation6], 1 }
 0x3c3   :  { %1292 = vsyncpa [#allocation6 + $0x1], 1 }
 0x3c4   :  { %1293 = vsyncpa [#allocation11], 1 }
 0x3c5   :  { %1295 = vsyncpa [#allocation11 + $0x1], 1 }
 0x3c6   :  { %1296 = vsyncpa [#allocation14], 1 }
 0x3c7   :  { %1298 = vsyncpa [#allocation14 + $0x1], 1 }
 0x3c8   :  { %1299 = vsyncpa [#allocation17], 1 }
 0x3c9   :  { %1301 = vsyncpa [#allocation17 + $0x1], 1 }

</bundles_post_ra>
